<compile_context>
chip_gen: v5e
topology: v5e:2x2
jax: 0.10.0
libtpu: 0.0.40
codegen_flags: <defaults>
</compile_context>

<pallas_src>
import math

import jax
import jax.numpy as jnp
from jax.experimental import pallas as pl
from jax.experimental.pallas import tpu as pltpu

_EPS = 1e-8  # same eps as torch.nn.functional.cosine_similarity


# --------------------------------------------------------------------------
# Kernel: streamed sequence-sum with resident f32 output accumulators.
# --------------------------------------------------------------------------
def _simsiam_sum_kernel(x1_ref, x2_ref, s1_ref, s2_ref):
    s = pl.program_id(1)  # seq (reduction) axis is the LAST grid axis

    @pl.when(s == 0)
    def _init():
        s1_ref[...] = jnp.zeros_like(s1_ref)
        s2_ref[...] = jnp.zeros_like(s2_ref)

    # Sequence-sum of the streamed tile, accumulated in float32 directly in
    # the resident output block (no extra scratch, no full-tile f32 copies).
    # TODO(synk): for bf16 inputs, verify in the Mosaic dump that this does
    # not materialize a widened f32 copy of the whole tile; if it does, keep
    # 8 sublanes of partials in the hot loop and collapse them once at the end.
    s1_ref[...] += jnp.sum(x1_ref[...], axis=1, dtype=jnp.float32)
    s2_ref[...] += jnp.sum(x2_ref[...], axis=1, dtype=jnp.float32)


# --------------------------------------------------------------------------
# Shape / tiling helpers (all static Python, run at trace time).
# --------------------------------------------------------------------------
def _round_up(x, m):
    return -(-x // m) * m


def _lane_fold_factor(S, H):
    """Smallest k with (k*H) % 128 == 0 and k | S; 1 if no clean fold exists."""
    if H % 128 == 0:
        return 1
    k = 128 // math.gcd(H, 128)
    if k <= S and S % k == 0:
        return k
    # TODO(synk): pad / partial-fold when S is not divisible by the fold factor.
    return 1


def _batch_split_factor(B, SF):
    """Split factor m (dividing SF) so the kernel sees B*m rows that tile into
    >=2 batch blocks of multiple-of-8 rows (keeps both v7x TensorCores busy).
    Returns 1 when B is already fine or no clean split exists."""
    if B >= 16 and B % 8 == 0:
        return 1
    for m in (2, 4, 8, 16, 32, 64):
        if SF % m == 0 and (B * m) % 8 == 0 and B * m >= 16:
            return m
    return 1


def _largest_aligned_divisor(n, cap, align):
    """Largest divisor of n that is a multiple of `align` and <= cap; 0 if none."""
    best = 0
    cap = min(cap, n)
    d = align
    while d <= cap:
        if n % d == 0:
            best = d
        d += align
    return best


def _choose_tiles(B_rows, SF, HF, itemsize):
    """Pick (tile_b, tile_s) jointly so each grid step moves ~4 MiB of PADDED
    payload per input, the batch grid exposes >=2 parallel tiles when it can,
    and every block satisfies the (8, 128) constraint."""
    sub = max(8, 32 // itemsize)          # sublane packing: 8 f32 / 16 bf16 / 32 i8
    hf_pad = _round_up(HF, 128)           # lane padding
    budget = 4 * 1024 * 1024              # padded bytes per input tile per step

    # Batch tile: multiple of 8 (output block second-to-last dim) or full B.
    if B_rows % 8 == 0:
        tile_b = 8
    else:
        # Full-dim block is the only legal non-multiple-of-8 choice.
        tile_b = B_rows

    def padded_bytes(tb, ts):
        return tb * _round_up(ts, sub) * hf_pad * itemsize

    # Sequence tile: biggest aligned divisor fitting the padded budget.
    cap_rows = max(1, budget // max(1, tile_b * hf_pad * itemsize))
    tile_s = 0
    for align in (sub, 8):
        if SF % align == 0:
            tile_s = _largest_aligned_divisor(SF, cap=max(align, cap_rows), align=align)
            if tile_s:
                break
    if not tile_s:
        tile_s = SF  # full extent is always a legal block dim

    # If the whole sequence already fits one step, grow the batch tile toward
    # the budget — but keep >=2 batch tiles so megacore sharding stays useful.
    if tile_s == SF and tile_b < B_rows:
        while (B_rows % (tile_b * 2) == 0
               and B_rows // (tile_b * 2) >= 2
               and padded_bytes(tile_b * 2, tile_s) <= budget):
            tile_b *= 2

    return tile_b, tile_s, sub, hf_pad


# --------------------------------------------------------------------------
# Wrapper.
# --------------------------------------------------------------------------
def simsiam_loss(x1, x2):
    """SimSiam forward: L = D(x1, x2)/2 + D(x2, x1)/2 (simplified D)."""
    assert x1.shape == x2.shape and x1.ndim == 3, (x1.shape, x2.shape)
    B, S, H = x1.shape
    itemsize = jnp.dtype(x1.dtype).itemsize

    # 1) Lane fold: [B, S, H] -> [B, S/k, k*H] with k*H a multiple of 128.
    k = _lane_fold_factor(S, H)
    SF, HF = S // k, k * H

    # 2) Batch split for megacore: [B, SF, HF] -> [B*m, SF/m, HF].
    m = _batch_split_factor(B, SF)
    B_rows, SF = B * m, SF // m

    # Contiguous row-major reshapes: pure bitcasts, no data movement.
    xf1 = x1.reshape(B_rows, SF, HF)
    xf2 = x2.reshape(B_rows, SF, HF)

    tile_b, tile_s, sub, hf_pad = _choose_tiles(B_rows, SF, HF, itemsize)
    assert B_rows % tile_b == 0 and SF % tile_s == 0, (B_rows, SF, tile_b, tile_s)
    assert tile_b % 8 == 0 or tile_b == B_rows
    assert tile_s % 8 == 0 or tile_s == SF

    # Reduction (seq) axis last in the grid — required by the s==0 reset.
    grid = (B_rows // tile_b, SF // tile_s)

    # VMEM plan from the PADDED footprint: 2 inputs x 2 pipeline buffers of the
    # input tile + 2 resident f32 accumulators.  Clamp the requested scoped
    # limit to 48 MiB so the same plan is safe on v7x (64 MiB physical VMEM)
    # as well as v5e/v6e (128 MiB).
    in_bytes = 2 * 2 * tile_b * _round_up(tile_s, sub) * hf_pad * itemsize
    out_bytes = 2 * 2 * _round_up(tile_b, 8) * hf_pad * 4
    vmem_limit = int(min(48 << 20, max(32 << 20, (in_bytes + out_bytes) * 3 // 2)))

    in_spec = pl.BlockSpec((tile_b, tile_s, HF), lambda b, s: (b, s, 0))
    out_spec = pl.BlockSpec((tile_b, HF), lambda b, s: (b, 0))  # resident acc

    sums1, sums2 = pl.pallas_call(
        _simsiam_sum_kernel,
        out_shape=(
            jax.ShapeDtypeStruct((B_rows, HF), jnp.float32),
            jax.ShapeDtypeStruct((B_rows, HF), jnp.float32),
        ),
        grid_spec=pltpu.PrefetchScalarGridSpec(
            num_scalar_prefetch=0,
            grid=grid,
            in_specs=[in_spec, in_spec],
            out_specs=(out_spec, out_spec),
        ),
        compiler_params=pltpu.CompilerParams(
            dimension_semantics=("parallel", "arbitrary"),
            vmem_limit_bytes=vmem_limit,
        ),
        cost_estimate=pl.CostEstimate(
            flops=2 * B_rows * SF * HF,
            transcendentals=0,
            bytes_accessed=2 * B_rows * SF * HF * itemsize + 2 * B_rows * HF * 4,
        ),
    )(xf1, xf2)

    # Collapse the batch-split (m) and lane-fold (k) groups, convert raw sums
    # to means (matches torch exactly and keeps f32 intermediates small), then
    # finish the trivial [B, H]-sized cosine + batch mean here.
    p1 = sums1.reshape(B, m * k, H).sum(axis=1) / S
    p2 = sums2.reshape(B, m * k, H).sum(axis=1) / S
    dot = jnp.sum(p1 * p2, axis=-1)
    n1 = jnp.sqrt(jnp.sum(p1 * p1, axis=-1))
    n2 = jnp.sqrt(jnp.sum(p2 * p2, axis=-1))
    cos = dot / jnp.maximum(n1 * n2, _EPS)

    # detach() is a no-op in the forward pass -> D(x1,x2) == D(x2,x1),
    # so L = D/2 + D/2 = -mean(cos).
    return -jnp.mean(cos)


def _simsiam_loss_ref(x1, x2):
    """Plain-JAX reference of the PyTorch forward (for verification)."""
    def d(p, z):
        p = jnp.mean(p.astype(jnp.float32), axis=1)
        z = jnp.mean(z.astype(jnp.float32), axis=1)
        dot = jnp.sum(p * z, axis=-1)
        denom = jnp.maximum(
            jnp.linalg.norm(p, axis=-1) * jnp.linalg.norm(z, axis=-1), _EPS)
        return -jnp.mean(dot / denom)
    return d(x1, x2) / 2 + d(x2, x1) / 2


if __name__ == "__main__":
    key = jax.random.PRNGKey(0)
    k1, k2, k3, k4 = jax.random.split(key, 4)

    # Small shape consistent with the module usage: [batch, seq, hidden].
    B, S, H = 2, 8, 32
    x1 = jax.random.normal(k1, (B, S, H), dtype=jnp.float32)
    x2 = jax.random.normal(k2, (B, S, H), dtype=jnp.float32)
    loss = jax.block_until_ready(simsiam_loss(x1, x2))
    ref = jax.block_until_ready(_simsiam_loss_ref(x1, x2))
    assert jnp.allclose(loss, ref, atol=1e-5, rtol=1e-5), (loss, ref)

    # Second shape exercising the lane fold, both grid axes, and >=2 parallel
    # batch tiles (megacore path).
    B2, S2, H2 = 16, 64, 32
    y1 = jax.random.normal(k3, (B2, S2, H2), dtype=jnp.float32)
    y2 = jax.random.normal(k4, (B2, S2, H2), dtype=jnp.float32)
    loss2 = jax.block_until_ready(simsiam_loss(y1, y2))
    ref2 = jax.block_until_ready(_simsiam_loss_ref(y1, y2))
    assert jnp.allclose(loss2, ref2, atol=1e-5, rtol=1e-5), (loss2, ref2)

    print("KERNEL_OK")
</pallas_src>

<mosaic_0001>
module attributes {stable_mosaic.version = 11 : i64} {
  func.func @_simsiam_sum_kernel(%arg0: i32, %arg1: i32, %arg2: memref<2x2x128xf32, #tpu.memory_space<vmem>>, %arg3: memref<2x2x128xf32, #tpu.memory_space<vmem>>, %arg4: memref<2x128xf32, #tpu.memory_space<vmem>>, %arg5: memref<2x128xf32, #tpu.memory_space<vmem>>) attributes {dimension_semantics = [#tpu.dimension_semantics<parallel>, #tpu.dimension_semantics<arbitrary>], iteration_bounds = array<i64: 1, 1>, scalar_prefetch = 0 : i64, scratch_operands = 0 : i64, tpu.core_type = #tpu.core_type<tc>, window_params = [{transform_indices = @transform_0, window_bounds = array<i64: 2, 2, 128>}, {transform_indices = @transform_1, window_bounds = array<i64: 2, 2, 128>}, {transform_indices = @transform_2, window_bounds = array<i64: 2, 128>}, {transform_indices = @transform_3, window_bounds = array<i64: 2, 128>}]} {
    %c0_i32 = arith.constant 0 : i32
    %0 = arith.cmpi eq, %arg1, %c0_i32 : i32
    %1 = arith.extui %0 : i1 to i32
    %c0_i32_0 = arith.constant 0 : i32
    %2 = arith.cmpi ne, %1, %c0_i32_0 : i32
    scf.if %2 {
      %cst_15 = arith.constant 0.000000e+00 : f32
      %13 = vector.broadcast %cst_15 : f32 to vector<2x128xf32>
      %c0_16 = arith.constant 0 : index
      %c0_17 = arith.constant 0 : index
      %14 = vector.load %arg4[%c0_16, %c0_17] : memref<2x128xf32, #tpu.memory_space<vmem>>, vector<2x128xf32>
      tpu.vector_store %arg4[%c0_16, %c0_17], %13 {strides = array<i32>} : memref<2x128xf32, #tpu.memory_space<vmem>>, vector<2x128xf32>,
      %cst_18 = arith.constant 0.000000e+00 : f32
      %15 = vector.broadcast %cst_18 : f32 to vector<2x128xf32>
      %c0_19 = arith.constant 0 : index
      %c0_20 = arith.constant 0 : index
      %16 = vector.load %arg5[%c0_19, %c0_20] : memref<2x128xf32, #tpu.memory_space<vmem>>, vector<2x128xf32>
      tpu.vector_store %arg5[%c0_19, %c0_20], %15 {strides = array<i32>} : memref<2x128xf32, #tpu.memory_space<vmem>>, vector<2x128xf32>,
    } else {
    }
    %c0 = arith.constant 0 : index
    %c0_1 = arith.constant 0 : index
    %3 = vector.load %arg4[%c0, %c0_1] : memref<2x128xf32, #tpu.memory_space<vmem>>, vector<2x128xf32>
    %c0_2 = arith.constant 0 : index
    %c0_3 = arith.constant 0 : index
    %c0_4 = arith.constant 0 : index
    %4 = vector.load %arg2[%c0_2, %c0_3, %c0_4] : memref<2x2x128xf32, #tpu.memory_space<vmem>>, vector<2x2x128xf32>
    %cst = arith.constant dense<0.000000e+00> : vector<2x128xf32>
    %5 = vector.multi_reduction <add>, %4, %cst [1] : vector<2x2x128xf32> to vector<2x128xf32>
    %6 = arith.addf %3, %5 : vector<2x128xf32>
    %c0_5 = arith.constant 0 : index
    %c0_6 = arith.constant 0 : index
    %7 = vector.load %arg4[%c0_5, %c0_6] : memref<2x128xf32, #tpu.memory_space<vmem>>, vector<2x128xf32>
    tpu.vector_store %arg4[%c0_5, %c0_6], %6 {strides = array<i32>} : memref<2x128xf32, #tpu.memory_space<vmem>>, vector<2x128xf32>,
    %c0_7 = arith.constant 0 : index
    %c0_8 = arith.constant 0 : index
    %8 = vector.load %arg5[%c0_7, %c0_8] : memref<2x128xf32, #tpu.memory_space<vmem>>, vector<2x128xf32>
    %c0_9 = arith.constant 0 : index
    %c0_10 = arith.constant 0 : index
    %c0_11 = arith.constant 0 : index
    %9 = vector.load %arg3[%c0_9, %c0_10, %c0_11] : memref<2x2x128xf32, #tpu.memory_space<vmem>>, vector<2x2x128xf32>
    %cst_12 = arith.constant dense<0.000000e+00> : vector<2x128xf32>
    %10 = vector.multi_reduction <add>, %9, %cst_12 [1] : vector<2x2x128xf32> to vector<2x128xf32>
    %11 = arith.addf %8, %10 : vector<2x128xf32>
    %c0_13 = arith.constant 0 : index
    %c0_14 = arith.constant 0 : index
    %12 = vector.load %arg5[%c0_13, %c0_14] : memref<2x128xf32, #tpu.memory_space<vmem>>, vector<2x128xf32>
    tpu.vector_store %arg5[%c0_13, %c0_14], %11 {strides = array<i32>} : memref<2x128xf32, #tpu.memory_space<vmem>>, vector<2x128xf32>,
    return
  }
  func.func @transform_0(%arg0: i32, %arg1: i32) -> (i32, i32, i32) {
    %c0_i32 = arith.constant 0 : i32
    %c0_i32_0 = arith.constant 0 : i32
    return %arg0, %arg1, %c0_i32 : i32, i32, i32
  }
  func.func @transform_1(%arg0: i32, %arg1: i32) -> (i32, i32, i32) {
    %c0_i32 = arith.constant 0 : i32
    %c0_i32_0 = arith.constant 0 : i32
    return %arg0, %arg1, %c0_i32 : i32, i32, i32
  }
  func.func @transform_2(%arg0: i32, %arg1: i32) -> (i32, i32) {
    %c0_i32 = arith.constant 0 : i32
    %c0_i32_0 = arith.constant 0 : i32
    return %arg0, %c0_i32 : i32, i32
  }
  func.func @transform_3(%arg0: i32, %arg1: i32) -> (i32, i32) {
    %c0_i32 = arith.constant 0 : i32
    %c0_i32_0 = arith.constant 0 : i32
    return %arg0, %c0_i32 : i32, i32
  }
}

</mosaic_0001>

<bundles_post_ra>
// kernel: tpu_custom_call.1
= control target key start
LH: loop header
LB: loop body
LE: loop exit
PB: predicated region body
PF: predicated region fallthrough
CT: control target
= control target key end

     0   :  { %9 = vsyncpa [#allocation3], 0  ;;  %s287_s0 = inlined_call_operand.hbm [shape: f32[2,2,128], index: 0, kind: input, shape index: {}]   ;;  %s288_s1 = inlined_call_operand.hbm [shape: f32[2,2,128], index: 1, kind: input, shape index: {}]   ;;  %s289_s2 = inlined_call_operand.hbm [shape: f32[2,128], index: 2, kind: output, shape index: {0}]   ;;  %s290_s3 = inlined_call_operand.hbm [shape: f32[2,128], index: 3, kind: output, shape index: {1}]  }
   0x1   :  { %10 = vsyncpa [#allocation6], 0 }
   0x2   :  { %11 = vsyncpa [#allocation4], 0 }
   0x3   :  { %12 = vsyncpa [#allocation9], 0  ;;  %s17_s14 = sshll.u32 %s287_s0, 4  ;;  %s246_s15 = smov [#allocation2]   ;;  %s18_s14 = int_to_ptr.hbm [resolvable:$true] %s17_s14 }
   0x4   :  { %s19_s16 = sshll.u32 %s246_s15, 4  ;;  %s30_s19 = sshll.u32 %s288_s1, 4  ;;  %s20_s16 = int_to_ptr.vmem [resolvable:$true] %s19_s16  ;;  %s31_s19 = int_to_ptr.hbm [resolvable:$true] %s30_s19 }
   0x5   :  { %s247_s20 = smov 32   ;;  %s248_s21 = smov 2  }
   0x6   :  { %25 = dma.hbm_to_vmem [thread:$0]  %s18_s14, 64, %s20_s16, [#allocation3], %s247_s20, %s247_s20, %s248_s21  }
   0x7   :  { %s249_s22 = smov [#allocation5]  }
   0x8   :  { %s32_s23 = sshll.u32 %s249_s22, 4  ;;  %s33_s23 = int_to_ptr.vmem [resolvable:$true] %s32_s23 }
   0x9   :  { %38 = dma.hbm_to_vmem [thread:$0]  %s31_s19, 64, %s33_s23, [#allocation6], %s247_s20, %s247_s20, %s248_s21  }
   0xa   :  { %238 = dma.done.wait [#allocation3], 64  }
   0xb   :  { %239 = vsyncadd [#allocation3], 4294967232 }
   0xc   :  { %240 = dma.done.wait [#allocation6], 64  }
   0xd   :  { %241 = vsyncadd [#allocation6], 4294967232  ;;  %v250_v0 = vmov 0.0   ;;  %vm56_vm0 = vcmask 1041408   ;;  %v54_v1 = vld [vmem:[#allocation2] sm:$0x3] }
   0xe   :  { %51 = vst [vmem:[#allocation7] sm:$0x3] %v250_v0  ;;  %v55_v2 = vld [vmem:[#allocation2 + $0x2] sm:$0x3]  ;;  %v79_v3 = vld [vmem:[#allocation5] sm:$0x3] }
   0xf   :  { %52 = vst [vmem:[#allocation8] sm:$0x3] %v250_v0  ;;  %v57_v4 = vsel %vm56_vm0, %v54_v1, 0.0  ;;  %v64_v5 = vsel %vm56_vm0, %v55_v2, 0.0  ;;  %v80_v6 = vld [vmem:[#allocation5 + $0x2] sm:$0x3] }
  0x10   :  { %v58_v7 = vrot.slane %v57_v4, 4  ;;  %v65_v8 = vrot.slane %v64_v5, 4  ;;  %v81_v9 = vsel %vm56_vm0, %v79_v3, 0.0  ;;  %v88_v10 = vsel %vm56_vm0, %v80_v6, 0.0  ;;  %s251_s0 = smov [#allocation7]   ;;  %s108_s26 = sshll.u32 %s289_s2, 4  ;;  %s109_s26 = int_to_ptr.hbm [resolvable:$true] %s108_s26 }
  0x11   :  { %v82_v11 = vrot.slane %v81_v9, 4  ;;  %v89_v12 = vrot.slane %v88_v10, 4  ;;  %vm73_vm1 = vcmask 1041409   ;;  %s106_s1 = sshll.u32 %s251_s0, 4  ;;  %s252_s27 = smov [#allocation8]   ;;  %s107_s1 = int_to_ptr.vmem [resolvable:$true] %s106_s1 }
  0x12   :  { %v59_v13 = vadd.f32 %v58_v7, %v57_v4  ;;  %v66_v14 = vadd.f32 %v65_v8, %v64_v5  ;;  %s117_s28 = sshll.u32 %s252_s27, 4  ;;  %s119_s4 = sshll.u32 %s290_s3, 4  ;;  %s118_s28 = int_to_ptr.vmem [resolvable:$true] %s117_s28  ;;  %s120_s4 = int_to_ptr.hbm [resolvable:$true] %s119_s4 }
  0x13   :  { %v83_v15 = vadd.f32 %v82_v11, %v81_v9  ;;  %v90_v16 = vadd.f32 %v89_v12, %v88_v10 }
  0x14   :  { %v60_v17 = vrot.slane %v59_v13, 2  ;;  %v67_v18 = vrot.slane %v66_v14, 2 }
  0x15   :  { %v84_v19 = vrot.slane %v83_v15, 2  ;;  %v91_v20 = vrot.slane %v90_v16, 2  ;;  %v53_v29 = vld [vmem:[#allocation7] sm:$0x3] }
  0x16   :  { %v61_v21 = vadd.f32 %v60_v17, %v59_v13  ;;  %v68_v22 = vadd.f32 %v67_v18, %v66_v14  ;;  %v78_v32 = vld [vmem:[#allocation8] sm:$0x3] }
  0x17   :  { %v85_v23 = vadd.f32 %v84_v19, %v83_v15  ;;  %v92_v24 = vadd.f32 %v91_v20, %v90_v16 }
  0x18   :  { %v62_v25 = vrot.slane %v61_v21, 1  ;;  %v69_v26 = vrot.slane %v68_v22, 1 }
  0x19   :  { %v86_v27 = vrot.slane %v85_v23, 1  ;;  %v93_v28 = vrot.slane %v92_v24, 1 }
  0x1a   :  { %v63_v30 = vadd.f32 %v62_v25, %v61_v21  ;;  %v70_v31 = vadd.f32 %v69_v26, %v68_v22 }
  0x1b   :  { %v87_v33 = vadd.f32 %v86_v27, %v85_v23  ;;  %v94_v34 = vadd.f32 %v93_v28, %v92_v24 }
  0x1c   :  { %v74_v35 = vsel %vm73_vm1, %v70_v31, %v63_v30 }
  0x1d   :  { %v76_v36 = vadd.f32 %v74_v35, %v53_v29  ;;  %v97_v37 = vsel %vm73_vm1, %v94_v34, %v87_v33 }
  0x1e   :  { %v99_v38 = vadd.f32 %v97_v37, %v78_v32 }
  0x1f   :  { %77 = vst [vmem:[#allocation7] sm:$0x3] %v76_v36 }
  0x20   :  { %100 = vst [vmem:[#allocation8] sm:$0x3] %v99_v38  ;;  %111 = dma.vmem_to_hbm [thread:$0]  %s107_s1, 32, %s109_s26, [#allocation4]  }
  0x21   :  { %122 = dma.vmem_to_hbm [thread:$0]  %s118_s28, 32, %s120_s4, [#allocation9]  }
  0x22   :  { %242 = dma.done.wait [#allocation4], 32  }
  0x23   :  { %243 = vsyncadd [#allocation4], 4294967264 }
  0x24   :  { %244 = dma.done.wait [#allocation9], 32  }
  0x25   :  { %245 = vsyncadd [#allocation9], 4294967264 }
  0x26   :  { %131 = vsyncpa [#allocation3], 1 }
  0x27   :  { %132 = vsyncpa [#allocation6], 1 }
  0x28   :  { %133 = vsyncpa [#allocation4], 1 }
  0x29   :  { %134 = vsyncpa [#allocation9], 1 }

</bundles_post_ra>
